<compile_context>
chip_gen: v7x
topology: tpu7x:2x2x1
jax: 0.10.0
libtpu: 0.0.40
codegen_flags: <defaults>
</compile_context>

<pallas_src>
import functools

import jax
import jax.numpy as jnp
from jax.experimental import pallas as pl
from jax.experimental.pallas import tpu as pltpu

LANES = 128             # vreg lane width
SUBLANES = 8            # vreg sublane count
TILE_ROWS = 4096        # rows of 128 lanes per grid step (multiple of 16)
MIN_PALLAS_ELEMS = 64 * 1024   # below this, pure-jnp is at least as fast


def _round_up(x, m):
    return ((x + m - 1) // m) * m


def _l1_loss_kernel(*refs, thr_static, tile_rows, total_rows, mask_rows):
    """Masked |y - pred| for one tile, reduced to an (8, 128) partial block."""
    if thr_static is None:
        thr_ref, y_ref, pred_ref, o_ref = refs
        thr = thr_ref[0]                   # traced threshold (SMEM prefetch)
    else:
        y_ref, pred_ref, o_ref = refs
        thr = thr_static                   # baked Python float

    # Upcast in-register: HBM traffic stays at the native (e.g. bf16) width.
    y = y_ref[...].astype(jnp.float32)     # (tile_rows, 128)
    p = pred_ref[...].astype(jnp.float32)  # (tile_rows, 128)

    cond = jnp.abs(y) >= thr
    if mask_rows:
        # Last grid block may hang off the end of the (rows, 128) array; the
        # out-of-bounds rows are garbage in VMEM, so mask by global row index.
        row_ids = (jax.lax.broadcasted_iota(jnp.int32, y.shape, 0)
                   + pl.program_id(0) * tile_rows)
        cond = jnp.logical_and(cond, row_ids < total_rows)

    contrib = jnp.where(cond, jnp.abs(y - p), 0.0)
    # Fold to one (8, 128) vreg tile with pure VPU adds; the single cross-lane
    # reduce happens once, outside the kernel, on the tiny partial array.
    o_ref[...] = jnp.sum(
        contrib.reshape(tile_rows // SUBLANES, SUBLANES, LANES), axis=0)


def l1_loss(edge_out, edge_y, accuracy_threshold, *,
            tile_rows=TILE_ROWS, min_pallas_elems=MIN_PALLAS_ELEMS):
    y = jnp.ravel(jnp.asarray(edge_y))        # keep native dtype
    pred = jnp.ravel(jnp.asarray(edge_out))   # keep native dtype
    n = y.shape[0]
    if n == 0:
        return jnp.float32(0.0)

    # Static Python scalar threshold -> bake into kernel; otherwise prefetch.
    thr_static = None
    if isinstance(accuracy_threshold, (int, float)) and not isinstance(
            accuracy_threshold, bool):
        thr_static = float(accuracy_threshold)

    # Small-n fast path: XLA's fused reduction beats per-call/grid overhead.
    if n < min_pallas_elems:
        yf = y.astype(jnp.float32)
        pf = pred.astype(jnp.float32)
        return jnp.sum(jnp.where(jnp.abs(yf) >= accuracy_threshold,
                                 jnp.abs(yf - pf), 0.0))

    # Pad to a multiple of 128 lanes only when needed (zeros contribute 0).
    rem = n % LANES
    if rem:
        pad = LANES - rem
        y = jnp.pad(y, (0, pad))
        pred = jnp.pad(pred, (0, pad))
    rows = y.shape[0] // LANES
    y2 = y.reshape(rows, LANES)               # free bitcast
    p2 = pred.reshape(rows, LANES)            # free bitcast

    # Tile rows: multiple of 16 (bf16 sublane packing) and of 8 (partial-sum
    # reshape); shrink for small arrays so we don't allocate oversized blocks.
    tr = min(_round_up(tile_rows, 2 * SUBLANES), _round_up(rows, 2 * SUBLANES))
    num_tiles = pl.cdiv(rows, tr)
    mask_rows = (rows % tr) != 0

    kernel = functools.partial(_l1_loss_kernel, thr_static=thr_static,
                               tile_rows=tr, total_rows=rows,
                               mask_rows=mask_rows)

    if thr_static is None:
        num_prefetch = 1
        in_specs = [pl.BlockSpec((tr, LANES), lambda i, thr: (i, 0)),
                    pl.BlockSpec((tr, LANES), lambda i, thr: (i, 0))]
        out_spec = pl.BlockSpec((SUBLANES, LANES), lambda i, thr: (i, 0))
        thr_arr = jnp.reshape(jnp.asarray(accuracy_threshold, jnp.float32), (1,))
        args = (thr_arr, y2, p2)
    else:
        num_prefetch = 0
        in_specs = [pl.BlockSpec((tr, LANES), lambda i: (i, 0)),
                    pl.BlockSpec((tr, LANES), lambda i: (i, 0))]
        out_spec = pl.BlockSpec((SUBLANES, LANES), lambda i: (i, 0))
        args = (y2, p2)

    partials = pl.pallas_call(
        kernel,
        out_shape=jax.ShapeDtypeStruct((num_tiles * SUBLANES, LANES),
                                       jnp.float32),
        grid_spec=pltpu.PrefetchScalarGridSpec(
            num_scalar_prefetch=num_prefetch,
            grid=(num_tiles,),
            in_specs=in_specs,
            out_specs=out_spec),
        compiler_params=pltpu.CompilerParams(
            dimension_semantics=("parallel",)),   # independent output blocks
    )(*args)

    return jnp.sum(partials)


def _l1_loss_ref(edge_out, edge_y, accuracy_threshold):
    ey = jnp.ravel(jnp.asarray(edge_y)).astype(jnp.float32)
    eo = jnp.ravel(jnp.asarray(edge_out)).astype(jnp.float32)
    cond = jnp.abs(ey) >= accuracy_threshold
    return jnp.sum(jnp.where(cond, jnp.abs(ey - eo), 0.0))


if __name__ == "__main__":
    key = jax.random.PRNGKey(0)
    threshold = 0.5

    # (n, dtype, threshold passed to the wrapper)
    cases = [
        (4096, jnp.float32, threshold),            # 128-aligned, no pad, no mask
        (1000, jnp.float32, threshold),            # pad to 1024 + row-masked block
        (2048, jnp.bfloat16, threshold),           # native bf16 streaming path
        (1000, jnp.float32, jnp.float32(0.5)),     # traced threshold -> SMEM prefetch
    ]
    for n, dt, thr_arg in cases:
        k1, k2, key = jax.random.split(key, 3)
        edge_out = jax.random.normal(k1, (n,), dtype=jnp.float32).astype(dt)
        edge_y = jax.random.normal(k2, (n,), dtype=jnp.float32).astype(dt)

        loss = l1_loss(edge_out, edge_y, thr_arg, min_pallas_elems=0)  # force Pallas
        jax.block_until_ready(loss)

        ref = _l1_loss_ref(edge_out, edge_y, threshold)
        assert jnp.allclose(loss, ref, rtol=1e-3, atol=1e-3), (n, dt, loss, ref)

    # Default small-n fast path (pure jnp) sanity check.
    k1, k2, key = jax.random.split(key, 3)
    edge_out = jax.random.normal(k1, (777,), dtype=jnp.float32)
    edge_y = jax.random.normal(k2, (777,), dtype=jnp.float32)
    loss = l1_loss(edge_out, edge_y, threshold)
    jax.block_until_ready(loss)
    assert jnp.allclose(loss, _l1_loss_ref(edge_out, edge_y, threshold),
                        rtol=1e-4, atol=1e-3)

    print("KERNEL_OK")
</pallas_src>

<mosaic_0001>
module attributes {stable_mosaic.version = 11 : i64} {
  func.func @_l1_loss_kernel(%arg0: i32, %arg1: memref<32x128xf32, #tpu.memory_space<vmem>>, %arg2: memref<32x128xf32, #tpu.memory_space<vmem>>, %arg3: memref<8x128xf32, #tpu.memory_space<vmem>>) attributes {dimension_semantics = [#tpu.dimension_semantics<parallel>], iteration_bounds = array<i64: 1>, scalar_prefetch = 0 : i64, scratch_operands = 0 : i64, tpu.core_type = #tpu.core_type<tc>, window_params = [{transform_indices = @transform_0, window_bounds = array<i64: 32, 128>}, {transform_indices = @transform_1, window_bounds = array<i64: 32, 128>}, {transform_indices = @transform_2, window_bounds = array<i64: 8, 128>}]} {
    %c0 = arith.constant 0 : index
    %c0_0 = arith.constant 0 : index
    %0 = vector.load %arg1[%c0, %c0_0] : memref<32x128xf32, #tpu.memory_space<vmem>>, vector<32x128xf32>
    %c0_1 = arith.constant 0 : index
    %c0_2 = arith.constant 0 : index
    %1 = vector.load %arg2[%c0_1, %c0_2] : memref<32x128xf32, #tpu.memory_space<vmem>>, vector<32x128xf32>
    %2 = math.absf %0 : vector<32x128xf32>
    %cst = arith.constant 5.000000e-01 : f32
    %3 = vector.broadcast %cst : f32 to vector<32x128xf32>
    %4 = arith.cmpf oge, %2, %3 : vector<32x128xf32>
    %5 = arith.subf %0, %1 : vector<32x128xf32>
    %6 = math.absf %5 : vector<32x128xf32>
    %cst_3 = arith.constant 0.000000e+00 : f32
    %7 = vector.broadcast %cst_3 : f32 to vector<32x128xf32>
    %8 = arith.select %4, %6, %7 : vector<32x128xi1>, vector<32x128xf32>
    %9 = vector.shape_cast %8 : vector<32x128xf32> to vector<4x8x128xf32>
    %cst_4 = arith.constant dense<0.000000e+00> : vector<8x128xf32>
    %10 = vector.multi_reduction <add>, %9, %cst_4 [0] : vector<4x8x128xf32> to vector<8x128xf32>
    %c0_5 = arith.constant 0 : index
    %c0_6 = arith.constant 0 : index
    %11 = vector.load %arg3[%c0_5, %c0_6] : memref<8x128xf32, #tpu.memory_space<vmem>>, vector<8x128xf32>
    tpu.vector_store %arg3[%c0_5, %c0_6], %10 {strides = array<i32>} : memref<8x128xf32, #tpu.memory_space<vmem>>, vector<8x128xf32>,
    return
  }
  func.func @transform_0(%arg0: i32) -> (i32, i32) {
    %c0_i32 = arith.constant 0 : i32
    %c0_i32_0 = arith.constant 0 : i32
    return %arg0, %c0_i32 : i32, i32
  }
  func.func @transform_1(%arg0: i32) -> (i32, i32) {
    %c0_i32 = arith.constant 0 : i32
    %c0_i32_0 = arith.constant 0 : i32
    return %arg0, %c0_i32 : i32, i32
  }
  func.func @transform_2(%arg0: i32) -> (i32, i32) {
    %c0_i32 = arith.constant 0 : i32
    %c0_i32_0 = arith.constant 0 : i32
    return %arg0, %c0_i32 : i32, i32
  }
}

</mosaic_0001>

<bundles_post_ra>
// kernel: tpu_custom_call.1
= control target key start
LH: loop header
LB: loop body
LE: loop exit
PB: predicated region body
PF: predicated region fallthrough
CT: control target
= control target key end

     0   :  { %7 = vsyncpa [#allocation3], 0  ;;  %s221_s0 = inlined_call_operand.hbm [shape: f32[32,128], index: 0, kind: input, shape index: {}]   ;;  %s222_s1 = inlined_call_operand.hbm [shape: f32[32,128], index: 1, kind: input, shape index: {}]   ;;  %s223_s2 = inlined_call_operand.hbm [shape: f32[8,128], index: 2, kind: output, shape index: {}]  }
   0x1   :  { %8 = vsyncpa [#allocation6], 0 }
   0x2   :  { %9 = vsyncpa [#allocation4], 0  ;;  %s165_s9 = smov [#allocation2]   ;;  %s93_s13 = scalar_lea.hbm %s221_s0, 512 }
   0x3   :  { %s15_s10 = sshll.u32 %s165_s9, 4  ;;  %p94_p0 = scmp.ne.s32.totalorder %s221_s0, %s93_s13  ;;  %s16_s10 = int_to_ptr.vmem [resolvable:$true] %s15_s10 }
   0x4   :  { %p97_p1 = scmp.lt.u32.totalorder %s93_s13, %s221_s0 }
   0x6   :  { %p99_p2 = pnand %p97_p1, %p94_p0 }
   0x8   :  { %102 = shalt.err (!%p99_p2)
}
   0x9   :  { %s103_s18 = scalar_lea.vmem %s16_s10, 512  ;;  %p108_p4 = scmp.lt.s32.totalorder %s16_s10, %s16_s10 }
   0xa   :  { %p104_p3 = scmp.ne.s32.totalorder %s16_s10, %s103_s18  ;;  %p109_p5 = scmp.lt.s32.totalorder %s103_s18, %s103_s18 }
   0xc   :  { %p110_p6 = por %p109_p5, %p108_p4 }
   0xe   :  { %p111_p7 = pnand %p110_p6, %p104_p3 }
  0x10   :  { %114 = shalt.err (!%p111_p7)
}
  0x11   :  { %s166_s19 = smov 128   ;;  %s167_s20 = smov 8  }
  0x12   :  { %21 = dma.hbm_to_vmem [thread:$0]  %s221_s0, 512, %s16_s10, [#allocation3], %s166_s19, %s166_s19, %s167_s20  }
  0x13   :  { %s168_s23 = smov [#allocation5]   ;;  %s115_s27 = scalar_lea.hbm %s222_s1, 512 }
  0x14   :  { %s27_s24 = sshll.u32 %s168_s23, 4  ;;  %p116_p8 = scmp.ne.s32.totalorder %s222_s1, %s115_s27  ;;  %s28_s24 = int_to_ptr.vmem [resolvable:$true] %s27_s24 }
  0x15   :  { %p119_p9 = scmp.lt.u32.totalorder %s115_s27, %s222_s1 }
  0x17   :  { %p121_p10 = pnand %p119_p9, %p116_p8 }
  0x19   :  { %124 = shalt.err (!%p121_p10)
}
  0x1a   :  { %s125_s4 = scalar_lea.vmem %s28_s24, 512  ;;  %p130_p12 = scmp.lt.s32.totalorder %s28_s24, %s28_s24 }
  0x1b   :  { %p126_p11 = scmp.ne.s32.totalorder %s28_s24, %s125_s4  ;;  %p131_p13 = scmp.lt.s32.totalorder %s125_s4, %s125_s4 }
  0x1d   :  { %p132_p0 = por %p131_p13, %p130_p12 }
  0x1f   :  { %p133_p1 = pnand %p132_p0, %p126_p11 }
  0x21   :  { %136 = shalt.err (!%p133_p1)
}
  0x22   :  { %33 = dma.hbm_to_vmem [thread:$0]  %s222_s1, 512, %s28_s24, [#allocation6], %s166_s19, %s166_s19, %s167_s20  }
  0x23   :  { %159 = dma.done.wait [#allocation3], 512  }
  0x24   :  { %160 = vsyncadd [#allocation3], 4294966784 }
  0x25   :  { %161 = dma.done.wait [#allocation6], 512  }
  0x26   :  { %162 = vsyncadd [#allocation6], 4294966784  ;;  %v40_v0 = vld [vmem:[#allocation2] sm:$0xff]  ;;  %v41_v1 = vld [vmem:[#allocation2 + $0x8] sm:$0xff]  ;;  %s169_s1 = smov [#allocation7]  }
  0x27   :  { %v42_v2 = vld [vmem:[#allocation2 + $0x10] sm:$0xff]  ;;  %v43_v3 = vld [vmem:[#allocation2 + $0x18] sm:$0xff]  ;;  %v44_v4 = vld [vmem:[#allocation5] sm:$0xff]  ;;  %v48_v6 = vand.u32 2147483647, %v40_v0  ;;  %s78_s6 = sshll.u32 %s169_s1, 4  ;;  %s79_s6 = int_to_ptr.vmem [resolvable:$true] %s78_s6 }
  0x28   :  { %v45_v5 = vld [vmem:[#allocation5 + $0x8] sm:$0xff]  ;;  %v46_v7 = vld [vmem:[#allocation5 + $0x10] sm:$0xff]  ;;  %v47_v8 = vld [vmem:[#allocation5 + $0x18] sm:$0xff]  ;;  %v49_v9 = vand.u32 2147483647, %v41_v1  ;;  %v56_v11 = vsub.f32 %v40_v0, %v44_v4  ;;  %s137_s7 = scalar_lea.vmem %s79_s6, 128  ;;  %p142_p3 = scmp.lt.s32.totalorder %s79_s6, %s79_s6 }
  0x29   :  { %v50_v10 = vand.u32 2147483647, %v42_v2  ;;  %v57_v12 = vsub.f32 %v41_v1, %v45_v5  ;;  %v51_v13 = vand.u32 2147483647, %v43_v3  ;;  %vm52_vm0 = vcmp.ge.f32.partialorder %v48_v6, 0.5  ;;  %p138_p2 = scmp.ne.s32.totalorder %s79_s6, %s137_s7  ;;  %p143_p4 = scmp.lt.s32.totalorder %s137_s7, %s137_s7 }
  0x2a   :  { %v58_v14 = vsub.f32 %v42_v2, %v46_v7  ;;  %v59_v15 = vsub.f32 %v43_v3, %v47_v8  ;;  %vm53_vm1 = vcmp.ge.f32.partialorder %v49_v9, 0.5  ;;  %v60_v16 = vand.u32 2147483647, %v56_v11 }
  0x2b   :  { %vm54_vm2 = vcmp.ge.f32.partialorder %v50_v10, 0.5  ;;  %v61_v17 = vand.u32 2147483647, %v57_v12  ;;  %vm55_vm3 = vcmp.ge.f32.partialorder %v51_v13, 0.5  ;;  %p144_p5 = por %p143_p4, %p142_p3 }
  0x2c   :  { %v62_v18 = vand.u32 2147483647, %v58_v14  ;;  %v63_v19 = vand.u32 2147483647, %v59_v15  ;;  %v64_v20 = vsel %vm52_vm0, %v60_v16, 0.0 }
  0x2d   :  { %v65_v21 = vsel %vm53_vm1, %v61_v17, 0.0  ;;  %p145_p6 = pnand %p144_p5, %p138_p2 }
  0x2e   :  { %v66_v22 = vsel %vm54_vm2, %v62_v18, 0.0  ;;  %v68_v23 = vadd.f32 %v65_v21, %v64_v20  ;;  %v67_v24 = vsel %vm55_vm3, %v63_v19, 0.0 }
  0x30   :  { %v69_v25 = vadd.f32 %v68_v23, %v66_v22 }
  0x32   :  { %v70_v26 = vadd.f32 %v69_v25, %v67_v24 }
  0x34   :  { %71 = vst [vmem:[#allocation7] sm:$0xff] %v70_v26 }
  0x35   :  { %148 = shalt.err (!%p145_p6)
}
  0x36   :  { %s149_s10 = scalar_lea.hbm %s223_s2, 128 }
  0x37   :  { %p150_p7 = scmp.ne.s32.totalorder %s223_s2, %s149_s10  ;;  %p153_p8 = scmp.lt.u32.totalorder %s149_s10, %s223_s2 }
  0x39   :  { %p155_p9 = pnand %p153_p8, %p150_p7 }
  0x3b   :  { %158 = shalt.err (!%p155_p9)
}
  0x3c   :  { %81 = dma.vmem_to_hbm [thread:$0]  %s79_s6, 128, %s223_s2, [#allocation4]  }
  0x3d   :  { %163 = dma.done.wait [#allocation4], 128  }
  0x3e   :  { %164 = vsyncadd [#allocation4], 4294967168 }
  0x3f   :  { %85 = vsyncpa [#allocation3], 1 }
  0x40   :  { %86 = vsyncpa [#allocation6], 1 }
  0x41   :  { %87 = vsyncpa [#allocation4], 1 }

</bundles_post_ra>
